<compile_context>
chip_gen: v7x
topology: tpu7x:2x2x1
jax: 0.10.0
libtpu: 0.0.40
codegen_flags: <defaults>
</compile_context>

<pallas_src>
import jax
import jax.numpy as jnp
from jax import lax
from jax.experimental import pallas as pl
from jax.experimental.pallas import tpu as pltpu
import numpy as np

D = 512  # embedding dim fixed by the module (layer3 expects 4*512 = 2048)


def _round_up(x, m):
    return ((x + m - 1) // m) * m


def siamese_kernel(ids_ref, emb_ref, w_ref, bd_ref, out_ref):
    """One batch tile: one-hot MXU gather + fused folded projection + 2-class log_softmax.

    ids_ref : VMEM (TILE_B, 2)  int32   token-id pairs (clamped to [0, V-1])
    emb_ref : VMEM (V_pad, 512) bf16    zero-padded embedding table (resident)
    w_ref   : VMEM (1024, 1)    f32     stacked folded weight [wa_delta ; wb_delta]
    bd_ref  : SMEM (1,)         f32     b3[1] - b3[0]
    out_ref : VMEM (TILE_B, 2)  f32     log-probabilities
    """
    tile_b = out_ref.shape[0]
    v_pad = emb_ref.shape[0]

    ids = ids_ref[...]                                            # (TILE_B, 2)
    iota = lax.broadcasted_iota(jnp.int32, (tile_b, v_pad), 1)
    oh0 = jnp.where(iota == ids[:, 0:1], 1.0, 0.0).astype(emb_ref.dtype)
    oh1 = jnp.where(iota == ids[:, 1:2], 1.0, 0.0).astype(emb_ref.dtype)

    emb = emb_ref[...]                                            # (V_pad, 512) bf16
    e0 = jnp.dot(oh0, emb, preferred_element_type=jnp.float32)    # (TILE_B, 512)
    e1 = jnp.dot(oh1, emb, preferred_element_type=jnp.float32)

    # delta = logits[:,1] - logits[:,0]; single mat-vec against the stacked
    # folded weight, bias difference folded in as one scalar.
    e01 = jnp.concatenate([e0, e1], axis=-1)                      # (TILE_B, 1024)
    delta = jnp.dot(e01, w_ref[...], preferred_element_type=jnp.float32) + bd_ref[0]

    # Stable 2-class log_softmax closed form (pure VPU/EUP, no XLU max/sum):
    #   out0 = -softplus(delta), out1 = delta - softplus(delta)
    sp = jnp.maximum(delta, 0.0) + jnp.log1p(jnp.exp(-jnp.abs(delta)))
    out_ref[:, 0:1] = -sp
    out_ref[:, 1:2] = delta - sp


def siamese_forward(inputs, emb_table, w3, b3, *, tile_b=None):
    """inputs: (B,2) int token ids; emb_table: (V,512); w3: (2,2048); b3: (2,)."""
    B = inputs.shape[0]
    V, d = emb_table.shape
    assert d == D and w3.shape == (2, 4 * D) and b3.shape == (2,)

    # --- batch tiling -------------------------------------------------------
    if tile_b is None:
        tile_b = min(512, _round_up(B, 8))
    tile_b = max(8, _round_up(tile_b, 8))
    b_pad = _round_up(B, tile_b)
    # v7x has 2 TensorCores: for non-trivial batches keep >= 2 grid steps so
    # the "parallel" axis can shard across cores.
    if b_pad // tile_b < 2 and b_pad >= 16:
        tile_b = _round_up(b_pad // 2, 8)
        b_pad = _round_up(B, tile_b)
    grid = (b_pad // tile_b,)

    # --- operand prep -------------------------------------------------------
    # Clamp ids (no runtime bounds check on VMEM reads); pad batch rows with 0.
    ids = jnp.clip(inputs.astype(jnp.int32), 0, V - 1)
    if b_pad != B:
        ids = jnp.pad(ids, ((0, b_pad - B), (0, 0)))

    # Pad the vocabulary to a lane multiple (128) so the in-kernel one-hot is
    # lane-dense; padded rows are zero and never selected by clamped ids.
    v_pad = _round_up(V, 128)
    emb_bf16 = jnp.pad(emb_table.astype(jnp.bfloat16), ((0, v_pad - V), (0, 0)))

    # Algebraic fold of the concat:  x = r0 @ Wa + r1 @ Wb + b, with
    #   Wa =  Wd + Ws + W0,  Wb = -Wd + Ws + W1   (Wt = W3.T split in four).
    # log_softmax over 2 classes only needs delta = x1 - x0, so keep only the
    # column differences, stacked into one (1024, 1) weight.
    wt = w3.T.astype(jnp.float32)                                   # (2048, 2)
    wd, ws, w0c, w1c = wt[0:D], wt[D:2 * D], wt[2 * D:3 * D], wt[3 * D:4 * D]
    wa = wd + ws + w0c                                              # (512, 2)
    wb = -wd + ws + w1c                                             # (512, 2)
    w_stacked = jnp.concatenate(
        [wa[:, 1] - wa[:, 0], wb[:, 1] - wb[:, 0]]).reshape(2 * D, 1)
    b_delta = (b3[1] - b3[0]).astype(jnp.float32).reshape(1)

    out = pl.pallas_call(
        siamese_kernel,
        out_shape=jax.ShapeDtypeStruct((b_pad, 2), jnp.float32),
        grid_spec=pltpu.PrefetchScalarGridSpec(
            num_scalar_prefetch=0,
            grid=grid,
            in_specs=[
                pl.BlockSpec((tile_b, 2), lambda i: (i, 0)),        # ids
                pl.BlockSpec((v_pad, D), lambda i: (0, 0)),         # emb table (resident)
                pl.BlockSpec((2 * D, 1), lambda i: (0, 0)),         # stacked folded weight
                pl.BlockSpec(memory_space=pltpu.MemorySpace.SMEM),  # bias delta scalar
            ],
            out_specs=pl.BlockSpec((tile_b, 2), lambda i: (i, 0)),
        ),
        compiler_params=pltpu.CompilerParams(
            dimension_semantics=("parallel",),
            # Demo sizes use only a few MiB of VMEM per step; set
            # vmem_limit_bytes explicitly if tile_b / V grow (v5e scoped
            # default is 16 MiB).
        ),
    )(ids, emb_bf16, w_stacked, b_delta)
    return out[:B]


def reference_forward(inputs, emb_table, w3, b3):
    """Pure-JAX reference mirroring the PyTorch forward exactly (f32)."""
    idx_t = inputs.T
    r0 = jnp.take(emb_table, idx_t[0], axis=0)
    r1 = jnp.take(emb_table, idx_t[1], axis=0)
    inp = jnp.concatenate([r0 - r1, r0 + r1, r0, r1], axis=1)      # (B, 2048)
    x = inp @ w3.T + b3
    return jax.nn.log_softmax(x, axis=1)


if __name__ == "__main__":
    key = jax.random.PRNGKey(0)
    k_emb, k_w, k_b, k_idx = jax.random.split(key, 4)

    B = 8        # batch (pairs of names)
    V = 16       # small synthetic vocabulary

    # Deterministic synthetic parameters (shapes from the module __init__).
    emb_table = jax.random.normal(k_emb, (V, D), dtype=jnp.float32) * 0.1
    w3 = jax.random.normal(k_w, (2, 4 * D), dtype=jnp.float32) * 0.02   # layer3.weight
    b3 = jax.random.normal(k_b, (2,), dtype=jnp.float32) * 0.02          # layer3.bias

    # Example input: (B, 2) int token ids.
    inputs = jax.random.randint(k_idx, (B, 2), 0, V, dtype=jnp.int32)

    out = jax.block_until_ready(siamese_forward(inputs, emb_table, w3, b3))
    ref = jax.block_until_ready(reference_forward(inputs, emb_table, w3, b3))

    assert out.shape == (B, 2) and out.dtype == jnp.float32
    # bf16 embedding table inside the kernel -> tolerance loosened vs f32 ref.
    assert np.allclose(np.asarray(out), np.asarray(ref), atol=5e-3, rtol=1e-3)

    print("KERNEL_OK")
</pallas_src>

<mosaic_0001>
module attributes {stable_mosaic.version = 11 : i64} {
  func.func @siamese_kernel(%arg0: i32, %arg1: memref<8x2xi32, #tpu.memory_space<vmem>>, %arg2: memref<128x512xbf16, #tpu.memory_space<vmem>>, %arg3: memref<1024x1xf32, #tpu.memory_space<vmem>>, %arg4: memref<1xf32, #tpu.memory_space<smem>>, %arg5: memref<8x2xf32, #tpu.memory_space<vmem>>) attributes {dimension_semantics = [#tpu.dimension_semantics<parallel>], iteration_bounds = array<i64: 1>, scalar_prefetch = 0 : i64, scratch_operands = 0 : i64, tpu.core_type = #tpu.core_type<tc>, window_params = [{transform_indices = @transform_0, window_bounds = array<i64: 8, 2>}, {pipeline_mode = #tpu.pipeline_mode<synchronous>, transform_indices = @transform_1, window_bounds = array<i64: 128, 512>}, {pipeline_mode = #tpu.pipeline_mode<synchronous>, transform_indices = @transform_2, window_bounds = array<i64: 1024, 1>}, {transform_indices = @transform_3, window_bounds = array<i64: 1>}, {transform_indices = @transform_4, window_bounds = array<i64: 8, 2>}]} {
    %c0 = arith.constant 0 : index
    %c0_0 = arith.constant 0 : index
    %0 = vector.load %arg1[%c0, %c0_0] : memref<8x2xi32, #tpu.memory_space<vmem>>, vector<8x2xi32>
    %1 = tpu.iota {dimensions = array<i32: 1>} : vector<8x128xi32>
    %2 = vector.extract_strided_slice %0 {offsets = [0, 0], sizes = [8, 1], strides = [1, 1]} : vector<8x2xi32> to vector<8x1xi32>
    %3 = vector.broadcast %2 : vector<8x1xi32> to vector<8x128xi32>
    %4 = arith.cmpi eq, %1, %3 : vector<8x128xi32>
    %cst = arith.constant 1.000000e+00 : f32
    %cst_1 = arith.constant 0.000000e+00 : f32
    %5 = vector.broadcast %cst : f32 to vector<8x128xf32>
    %6 = vector.broadcast %cst_1 : f32 to vector<8x128xf32>
    %7 = arith.select %4, %5, %6 : vector<8x128xi1>, vector<8x128xf32>
    %8 = arith.truncf %7 : vector<8x128xf32> to vector<8x128xbf16>
    %9 = vector.extract_strided_slice %0 {offsets = [0, 1], sizes = [8, 1], strides = [1, 1]} : vector<8x2xi32> to vector<8x1xi32>
    %10 = vector.broadcast %9 : vector<8x1xi32> to vector<8x128xi32>
    %11 = arith.cmpi eq, %1, %10 : vector<8x128xi32>
    %cst_2 = arith.constant 1.000000e+00 : f32
    %cst_3 = arith.constant 0.000000e+00 : f32
    %12 = vector.broadcast %cst_2 : f32 to vector<8x128xf32>
    %13 = vector.broadcast %cst_3 : f32 to vector<8x128xf32>
    %14 = arith.select %11, %12, %13 : vector<8x128xi1>, vector<8x128xf32>
    %15 = arith.truncf %14 : vector<8x128xf32> to vector<8x128xbf16>
    %c0_4 = arith.constant 0 : index
    %c0_5 = arith.constant 0 : index
    %16 = vector.load %arg2[%c0_4, %c0_5] : memref<128x512xbf16, #tpu.memory_space<vmem>>, vector<128x512xbf16>
    %cst_6 = arith.constant dense<0.000000e+00> : vector<8x512xf32>
    %17 = tpu.matmul %8, %16, %cst_6 {dimension_numbers = #tpu.dot_dimension_numbers<[1], [0], [0], [1], [0, 0, 1, 1], [], []>} : vector<8x128xbf16>, vector<128x512xbf16>, vector<8x512xf32> -> vector<8x512xf32>
    %cst_7 = arith.constant dense<0.000000e+00> : vector<8x512xf32>
    %18 = tpu.matmul %15, %16, %cst_7 {dimension_numbers = #tpu.dot_dimension_numbers<[1], [0], [0], [1], [0, 0, 1, 1], [], []>} : vector<8x128xbf16>, vector<128x512xbf16>, vector<8x512xf32> -> vector<8x512xf32>
    %19 = tpu.concatenate %17, %18 in 1 : vector<8x512xf32>, vector<8x512xf32> -> vector<8x1024xf32>
    %c0_8 = arith.constant 0 : index
    %c0_9 = arith.constant 0 : index
    %20 = vector.load %arg3[%c0_8, %c0_9] : memref<1024x1xf32, #tpu.memory_space<vmem>>, vector<1024x1xf32>
    %cst_10 = arith.constant dense<0.000000e+00> : vector<8x1xf32>
    %21 = tpu.matmul %19, %20, %cst_10 {dimension_numbers = #tpu.dot_dimension_numbers<[1], [0], [0], [1], [0, 0, 1, 1], [], []>} : vector<8x1024xf32>, vector<1024x1xf32>, vector<8x1xf32> -> vector<8x1xf32>
    %c0_11 = arith.constant 0 : index
    %22 = memref.load %arg4[%c0_11] : memref<1xf32, #tpu.memory_space<smem>>
    %23 = vector.broadcast %22 : f32 to vector<8x1xf32>
    %24 = arith.addf %21, %23 : vector<8x1xf32>
    %cst_12 = arith.constant 0.000000e+00 : f32
    %25 = vector.broadcast %cst_12 : f32 to vector<8x1xf32>
    %26 = arith.maximumf %24, %25 : vector<8x1xf32>
    %27 = math.absf %24 : vector<8x1xf32>
    %cst_13 = arith.constant 0.000000e+00 : f32
    %28 = vector.broadcast %cst_13 : f32 to vector<8x1xf32>
    %29 = arith.subf %28, %27 : vector<8x1xf32>
    %30 = math.exp %29 : vector<8x1xf32>
    %31 = math.log1p %30 : vector<8x1xf32>
    %32 = arith.addf %26, %31 : vector<8x1xf32>
    %cst_14 = arith.constant 0.000000e+00 : f32
    %33 = vector.broadcast %cst_14 : f32 to vector<8x1xf32>
    %34 = arith.subf %33, %32 : vector<8x1xf32>
    %c0_15 = arith.constant 0 : index
    %c0_16 = arith.constant 0 : index
    %35 = vector.load %arg5[%c0_15, %c0_16] : memref<8x2xf32, #tpu.memory_space<vmem>>, vector<8x1xf32>
    tpu.vector_store %arg5[%c0_15, %c0_16], %34 {strides = array<i32>} : memref<8x2xf32, #tpu.memory_space<vmem>>, vector<8x1xf32>,
    %36 = arith.subf %24, %32 : vector<8x1xf32>
    %c0_17 = arith.constant 0 : index
    %c1 = arith.constant 1 : index
    %37 = vector.load %arg5[%c0_17, %c1] : memref<8x2xf32, #tpu.memory_space<vmem>>, vector<8x1xf32>
    tpu.vector_store %arg5[%c0_17, %c1], %36 {strides = array<i32>} : memref<8x2xf32, #tpu.memory_space<vmem>>, vector<8x1xf32>,
    return
  }
  func.func @transform_0(%arg0: i32) -> (i32, i32) {
    %c0_i32 = arith.constant 0 : i32
    %c0_i32_0 = arith.constant 0 : i32
    return %arg0, %c0_i32 : i32, i32
  }
  func.func @transform_1(%arg0: i32) -> (i32, i32) {
    %c0_i32 = arith.constant 0 : i32
    %c0_i32_0 = arith.constant 0 : i32
    %c0_i32_1 = arith.constant 0 : i32
    return %c0_i32, %c0_i32_0 : i32, i32
  }
  func.func @transform_2(%arg0: i32) -> (i32, i32) {
    %c0_i32 = arith.constant 0 : i32
    %c0_i32_0 = arith.constant 0 : i32
    %c0_i32_1 = arith.constant 0 : i32
    return %c0_i32, %c0_i32_0 : i32, i32
  }
  func.func @transform_3(%arg0: i32) -> i32 {
    %c0_i32 = arith.constant 0 : i32
    %c0_i32_0 = arith.constant 0 : i32
    return %c0_i32 : i32
  }
  func.func @transform_4(%arg0: i32) -> (i32, i32) {
    %c0_i32 = arith.constant 0 : i32
    %c0_i32_0 = arith.constant 0 : i32
    return %arg0, %c0_i32 : i32, i32
  }
}

</mosaic_0001>

<bundles_post_ra>
// kernel: tpu_custom_call.1
= control target key start
LH: loop header
LB: loop body
LE: loop exit
PB: predicated region body
PF: predicated region fallthrough
CT: control target
= control target key end

     0   :  { %v1195_v0 = vmov 0   ;;  %v1196_v8 = vmov 1   ;;  %v20_v35 = vlaneseq  ;;  %v1197_v38 = vmov 1.0|1.0   ;;  %s1793_s0 = inlined_call_operand.vmem [shape: s32[8,2], index: 0, kind: input, shape index: {}]   ;;  %s1794_s1 = inlined_call_operand.vmem [shape: bf16[128,512], index: 1, kind: input, shape index: {}]   ;;  %s1795_s2 = inlined_call_operand.vmem [shape: f32[1024,1], index: 2, kind: input, shape index: {}]   ;;  %s1796_s3 = inlined_call_operand.<no memory space> [shape: f32[1], index: 3, kind: input, shape index: {}]   ;;  %s1797_s4 = inlined_call_operand.vmem [shape: f32[8,2], index: 4, kind: output, shape index: {}]  }
   0x1   :  { %1141 = vset.pattern.permute.xlu0 %v1195_v0  ;;  %v19_v1 = vld [vmem:[%s1793_s0] sm:$0xff]  ;;  %258 = vmatprep.mubr.bf16.mxu0 %v1195_v0  ;;  %v1238_v3 = vld [vmem:[%s1794_s1 + $0xc] ss:$16 sps:$4 sm:$0xff]   ;;  %v1248_v5 = vld [vmem:[%s1794_s1 + $0x8] ss:$16 sps:$4 sm:$0xff]   ;;  %vm816_vm5 = vcmask 7168  }
   0x2   :  { %23 = vperm.xlu0 %1141, %v19_v1   ;;  %v1232_v2 = vld [vmem:[%s1794_s1 + $0x4] ss:$16 sps:$4 sm:$0xff]   ;;  %299 = vmatprep.mubr.bf16.mxu1 %v1195_v0  ;;  %v1243_v4 = vld [vmem:[%s1794_s1] ss:$16 sps:$4 sm:$0xff]   ;;  %v1261_v7 = vld [vmem:[%s1794_s1 + $0x2c] ss:$16 sps:$4 sm:$0xff]  }
   0x3   :  { %226 = vmatprep.subr.bf16.mxu0 %v1232_v2  ;;  %v1254_v6 = vld [vmem:[%s1794_s1 + $0x24] ss:$16 sps:$4 sm:$0xff]   ;;  %267 = vmatprep.subr.bf16.mxu1 %v1238_v3  ;;  %v1267_v9 = vld [vmem:[%s1794_s1 + $0x20] ss:$16 sps:$4 sm:$0xff]   ;;  %v1272_v10 = vld [vmem:[%s1794_s1 + $0x28] ss:$16 sps:$4 sm:$0xff]  }
   0x4   :  { %227 = vmatpush1.bf16.msra.mxu0 %v1243_v4  ;;  %268 = vmatpush1.bf16.msra.mxu1 %v1248_v5  ;;  %v1278_v11 = vld [vmem:[%s1794_s1 + $0x44] ss:$16 sps:$4 sm:$0xff]   ;;  %v1284_v12 = vld [vmem:[%s1794_s1 + $0x4c] ss:$16 sps:$4 sm:$0xff]   ;;  %v1289_v13 = vld [vmem:[%s1794_s1 + $0x40] ss:$16 sps:$4 sm:$0xff]  }
   0x5   :  { %228 = vmatprep.subr.bf16.mxu0 %v1254_v6  ;;  %269 = vmatprep.subr.bf16.mxu1 %v1261_v7  ;;  %v1295_v14 = vld [vmem:[%s1794_s1 + $0x48] ss:$16 sps:$4 sm:$0xff]   ;;  %v1302_v15 = vld [vmem:[%s1794_s1 + $0x64] ss:$16 sps:$4 sm:$0xff]   ;;  %v1308_v16 = vld [vmem:[%s1794_s1 + $0x6c] ss:$16 sps:$4 sm:$0xff]  }
   0x6   :  { %1142 = vset.pattern.permute.xlu0 %v1196_v8  ;;  %v1165_v17 = vld [vmem:[%s1794_s1 + $0x60] ss:$16 sps:$4 sm:$0xff]   ;;  %v1166_v18 = vld [vmem:[%s1794_s1 + $0x68] ss:$16 sps:$4 sm:$0xff]   ;;  %v1167_v19 = vld [vmem:[%s1794_s1 + $0x84] ss:$16 sps:$4 sm:$0xff]  }
   0x7   :  { %29 = vperm.xlu0 %1142, %v19_v1   ;;  %v1169_v20 = vld [vmem:[%s1794_s1 + $0x8c] ss:$16 sps:$4 sm:$0xff]   ;;  %v1171_v21 = vld [vmem:[%s1794_s1 + $0x80] ss:$16 sps:$4 sm:$0xff]   ;;  %v1172_v22 = vld [vmem:[%s1794_s1 + $0x88] ss:$16 sps:$4 sm:$0xff]  }
   0x8   :  { %229 = vmatpush1.bf16.msra.mxu0 %v1267_v9  ;;  %270 = vmatpush1.bf16.msra.mxu1 %v1272_v10  ;;  %v1173_v23 = vld [vmem:[%s1794_s1 + $0xa4] ss:$16 sps:$4 sm:$0xff]   ;;  %v1175_v24 = vld [vmem:[%s1794_s1 + $0xac] ss:$16 sps:$4 sm:$0xff]   ;;  %v1177_v25 = vld [vmem:[%s1794_s1 + $0xa0] ss:$16 sps:$4 sm:$0xff]  }
   0x9   :  { %230 = vmatprep.subr.bf16.mxu0 %v1278_v11  ;;  %271 = vmatprep.subr.bf16.mxu1 %v1284_v12  ;;  %v1178_v26 = vld [vmem:[%s1794_s1 + $0xa8] ss:$16 sps:$4 sm:$0xff]   ;;  %v1179_v27 = vld [vmem:[%s1794_s1 + $0xc4] ss:$16 sps:$4 sm:$0xff]   ;;  %v1181_v28 = vld [vmem:[%s1794_s1 + $0xcc] ss:$16 sps:$4 sm:$0xff]  }
   0xa   :  { %v1183_v29 = vld [vmem:[%s1794_s1 + $0xc0] ss:$16 sps:$4 sm:$0xff]   ;;  %v1184_v30 = vld [vmem:[%s1794_s1 + $0xc8] ss:$16 sps:$4 sm:$0xff]   ;;  %v1185_v31 = vld [vmem:[%s1794_s1 + $0xe4] ss:$16 sps:$4 sm:$0xff]  }
   0xb   :  { %v1187_v32 = vld [vmem:[%s1794_s1 + $0xec] ss:$16 sps:$4 sm:$0xff]   ;;  %v1365_v33 = vld [vmem:[%s1794_s1 + $0xe0] ss:$16 sps:$4 sm:$0xff]   ;;  %v1190_v34 = vld [vmem:[%s1794_s1 + $0xe8] ss:$16 sps:$4 sm:$0xff]  }
   0xc   :  { %231 = vmatpush1.bf16.msra.mxu0 %v1289_v13  ;;  %272 = vmatpush1.bf16.msra.mxu1 %v1295_v14  ;;  %v21_v36 = vand.u32 127, %v20_v35  ;;  %v406_v39 = vld [vmem:[%s1795_s2 + $0x80] sm:$0xff]  ;;  %v407_v41 = vld [vmem:[%s1795_s2 + $0x88] sm:$0xff]  ;;  %v408_v50 = vld [vmem:[%s1795_s2 + $0x90] sm:$0xff]  ;;  %vm823_vm6 = vcmask 15368  }
   0xd   :  { %232 = vmatprep.subr.bf16.mxu0 %v1302_v15  ;;  %273 = vmatprep.subr.bf16.mxu1 %v1308_v16  ;;  %v438_v42 = vld [vmem:[%s1795_s2 + $0x180] sm:$0xff]  ;;  %v439_v43 = vld [vmem:[%s1795_s2 + $0x188] sm:$0xff]  ;;  %v1009_v46 = vpack.c.bf16 %v407_v41, %v406_v39  ;;  %v409_v51 = vld [vmem:[%s1795_s2 + $0x98] sm:$0xff] }
   0xe   :  { %v390_v44 = vld [vmem:[%s1795_s2] sm:$0xff]  ;;  %v391_v45 = vld [vmem:[%s1795_s2 + $0x8] sm:$0xff]  ;;  %v1041_v47 = vpack.c.bf16 %v439_v43, %v438_v42  ;;  %v440_v52 = vld [vmem:[%s1795_s2 + $0x190] sm:$0xff]  ;;  %v1013_v59 = vpack.c.bf16 %v409_v51, %v408_v50 }
   0xf   :  { %v422_v48 = vld [vmem:[%s1795_s2 + $0x100] sm:$0xff]  ;;  %v423_v49 = vld [vmem:[%s1795_s2 + $0x108] sm:$0xff]  ;;  %v441_v53 = vld [vmem:[%s1795_s2 + $0x198] sm:$0xff]  ;;  %v1011_v55 = vpack.c.bf16 %v391_v45, %v390_v44 }
  0x10   :  { %233 = vmatpush1.bf16.msra.mxu0 %v1165_v17  ;;  %274 = vmatpush1.bf16.msra.mxu1 %v1166_v18  ;;  %v1043_v56 = vpack.c.bf16 %v423_v49, %v422_v48  ;;  %v392_v57 = vld [vmem:[%s1795_s2 + $0x10] sm:$0xff]  ;;  %v393_v58 = vld [vmem:[%s1795_s2 + $0x18] sm:$0xff]  ;;  %v1045_v60 = vpack.c.bf16 %v441_v53, %v440_v52  ;;  %v410_v63 = vld [vmem:[%s1795_s2 + $0xa0] sm:$0xff] }
  0x11   :  { %234 = vmatprep.subr.bf16.mxu0 %v1167_v19  ;;  %275 = vmatprep.subr.bf16.mxu1 %v1169_v20  ;;  %v424_v61 = vld [vmem:[%s1795_s2 + $0x110] sm:$0xff]  ;;  %v425_v62 = vld [vmem:[%s1795_s2 + $0x118] sm:$0xff]  ;;  %v442_v1 = vld [vmem:[%s1795_s2 + $0x1a0] sm:$0xff] }
  0x12   :  { %v416_v35 = vld [vmem:[%s1795_s2 + $0xd0] sm:$0xff]  ;;  %v401_v42 = vld [vmem:[%s1795_s2 + $0x58] sm:$0xff]  ;;  %v419_v48 = vld [vmem:[%s1795_s2 + $0xe8] sm:$0xff] }
  0x13   :  { %v400_v41 = vld [vmem:[%s1795_s2 + $0x50] sm:$0xff]  ;;  %v450_v49 = vld [vmem:[%s1795_s2 + $0x1e0] sm:$0xff]  ;;  %v451_v50 = vld [vmem:[%s1795_s2 + $0x1e8] sm:$0xff] }
  0x14   :  { %235 = vmatpush1.bf16.msra.mxu0 %v1171_v21  ;;  %276 = vmatpush1.bf16.msra.mxu1 %v1172_v22  ;;  %v432_v45 = vld [vmem:[%s1795_s2 + $0x150] sm:$0xff]  ;;  %v1031_v51 = vpack.c.bf16 %v401_v42, %v400_v41  ;;  %v402_v53 = vld [vmem:[%s1795_s2 + $0x60] sm:$0xff]  ;;  %v403_v54 = vld [vmem:[%s1795_s2 + $0x68] sm:$0xff] }
  0x15   :  { %236 = vmatprep.subr.bf16.mxu0 %v1173_v23  ;;  %277 = vmatprep.subr.bf16.mxu1 %v1175_v24 }
  0x18   :  { %237 = vmatpush1.bf16.msra.mxu0 %v1177_v25  ;;  %278 = vmatpush1.bf16.msra.mxu1 %v1178_v26 }
  0x19   :  { %238 = vmatprep.subr.bf16.mxu0 %v1179_v27  ;;  %279 = vmatprep.subr.bf16.mxu1 %v1181_v28 }
  0x1c   :  { %239 = vmatpush1.bf16.msra.mxu0 %v1183_v29  ;;  %280 = vmatpush1.bf16.msra.mxu1 %v1184_v30 }
  0x1d   :  { %240 = vmatprep.subr.bf16.mxu0 %v1185_v31  ;;  %281 = vmatprep.subr.bf16.mxu1 %v1187_v32 }
  0x20   :  { %241 = vmatpush1.bf16.msra.mxu0 %v1365_v33  ;;  %282 = vmatpush1.bf16.msra.mxu1 %v1190_v34 }
  0x21   :  { %308 = vmatprep.subr.bf16.mxu0 %v1232_v2  ;;  %349 = vmatprep.subr.bf16.mxu1 %v1238_v3  ;;  %v443_v2 = vld [vmem:[%s1795_s2 + $0x1a8] sm:$0xff]  ;;  %v1015_v3 = vpack.c.bf16 %v393_v58, %v392_v57  ;;  %v434_v57 = vld [vmem:[%s1795_s2 + $0x160] sm:$0xff] }
  0x22   :  { %v1049_v8 = vpack.c.bf16 %v443_v2, %v442_v1  ;;  %v435_v58 = vld [vmem:[%s1795_s2 + $0x168] sm:$0xff]  ;;  %v404_v1 = vld [vmem:[%s1795_s2 + $0x70] sm:$0xff] }
  0x81   :  { %v24_v37 = vpop.permute.xlu0 %23 }
  0x82   :  { %vm25_vm0 = vcmp.eq.s32.totalorder %v21_v36, %v24_v37  ;;  %v448_v37 = vld [vmem:[%s1795_s2 + $0x1d0] sm:$0xff] }
  0x83   :  { %vm861_vm1 = vmpackc.low %vm25_vm0, %vm25_vm0 }
  0x84   :  { %862 = vmatmul.mubr.msk.bf16.vlgmr.msra.gmra.mrb[0].mxu0 %vm861_vm1, %v1197_v38  ;;  %864 = vmatmul.mubr.msk.bf16.vlgmr.msra.gmra.mrb[0].mxu1 %vm861_vm1, %v1197_v38 }
  0x85   :  { %309 = vmatpush1.bf16.msra.mxu0 %v1243_v4  ;;  %350 = vmatpush1.bf16.msra.mxu1 %v1248_v5  ;;  %v1047_v4 = vpack.c.bf16 %v425_v62, %v424_v61  ;;  %v394_v5 = vld [vmem:[%s1795_s2 + $0x20] sm:$0xff]  ;;  %v452_v61 = vld [vmem:[%s1795_s2 + $0x1f0] sm:$0xff]  ;;  %v453_v62 = vld [vmem:[%s1795_s2 + $0x1f8] sm:$0xff] }
  0x86   :  { %310 = vmatprep.subr.bf16.mxu0 %v1254_v6  ;;  %351 = vmatprep.subr.bf16.mxu1 %v1261_v7  ;;  %v30_v40 = vpop.permute.xlu0 %29  ;;  %v395_v6 = vld [vmem:[%s1795_s2 + $0x28] sm:$0xff] }
  0x87   :  { %340 = vmatprep.mubr.bf16.mxu0 %v1195_v0  ;;  %381 = vmatprep.mubr.bf16.mxu1 %v1195_v0  ;;  %vm31_vm2 = vcmp.eq.s32.totalorder %v21_v36, %v30_v40  ;;  %v411_v0 = vld [vmem:[%s1795_s2 + $0xa8] sm:$0xff]  ;;  %v417_v36 = vld [vmem:[%s1795_s2 + $0xd8] sm:$0xff] }
  0x88   :  { %vm1426_vm3 = vmpackc.low %vm31_vm2, %vm31_vm2  ;;  %v1017_v7 = vpack.c.bf16 %v411_v0, %v410_v63  ;;  %v1029_v43 = vpack.c.bf16 %v417_v36, %v416_v35  ;;  %v1035_v63 = vpack.c.bf16 %v403_v54, %v402_v53  ;;  %v1067_v0 = vpack.c.bf16 %v435_v58, %v434_v57  ;;  %v474_v35 = vld [vmem:[%s1795_s2 + $0x2a0] sm:$0xff]  ;;  %v508_v53 = vld [vmem:[%s1795_s2 + $0x3b0] sm:$0xff] }
  0x89   :  { %311 = vmatpush1.bf16.msra.mxu0 %v1267_v9  ;;  %352 = vmatpush1.bf16.msra.mxu1 %v1272_v10  ;;  %v426_v9 = vld [vmem:[%s1795_s2 + $0x120] sm:$0xff]  ;;  %v427_v10 = vld [vmem:[%s1795_s2 + $0x128] sm:$0xff]  ;;  %v509_v54 = vld [vmem:[%s1795_s2 + $0x3b8] sm:$0xff] }
  0x8a   :  { %312 = vmatprep.subr.bf16.mxu0 %v1278_v11  ;;  %353 = vmatprep.subr.bf16.mxu1 %v1284_v12  ;;  %v412_v11 = vld [vmem:[%s1795_s2 + $0xb0] sm:$0xff]  ;;  %v413_v12 = vld [vmem:[%s1795_s2 + $0xb8] sm:$0xff] }
  0x8b   :  { %v460_v57 = vld [vmem:[%s1795_s2 + $0x230] sm:$0xff]  ;;  %v461_v58 = vld [vmem:[%s1795_s2 + $0x238] sm:$0xff] }
  0x8d   :  { %313 = vmatpush1.bf16.msra.mxu0 %v1289_v13  ;;  %354 = vmatpush1.bf16.msra.mxu1 %v1295_v14  ;;  %v444_v13 = vld [vmem:[%s1795_s2 + $0x1b0] sm:$0xff]  ;;  %v445_v14 = vld [vmem:[%s1795_s2 + $0x1b8] sm:$0xff] }
  0x8e   :  { %314 = vmatprep.subr.bf16.mxu0 %v1302_v15  ;;  %355 = vmatprep.subr.bf16.mxu1 %v1308_v16  ;;  %v1019_v15 = vpack.c.bf16 %v395_v6, %v394_v5  ;;  %v1051_v16 = vpack.c.bf16 %v427_v10, %v426_v9  ;;  %v436_v5 = vld [vmem:[%s1795_s2 + $0x170] sm:$0xff]  ;;  %v437_v6 = vld [vmem:[%s1795_s2 + $0x178] sm:$0xff]  ;;  %v470_v9 = vld [vmem:[%s1795_s2 + $0x280] sm:$0xff] }
  0x8f   :  { %v471_v10 = vld [vmem:[%s1795_s2 + $0x288] sm:$0xff] }
  0x91   :  { %315 = vmatpush1.bf16.msra.mxu0 %v1165_v17  ;;  %356 = vmatpush1.bf16.msra.mxu1 %v1166_v18  ;;  %v396_v17 = vld [vmem:[%s1795_s2 + $0x30] sm:$0xff]  ;;  %v397_v18 = vld [vmem:[%s1795_s2 + $0x38] sm:$0xff] }
  0x92   :  { %316 = vmatprep.subr.bf16.mxu0 %v1167_v19  ;;  %357 = vmatprep.subr.bf16.mxu1 %v1169_v20  ;;  %v1021_v19 = vpack.c.bf16 %v413_v12, %v412_v11  ;;  %v1053_v20 = vpack.c.bf16 %v445_v14, %v444_v13  ;;  %v502_v11 = vld [vmem:[%s1795_s2 + $0x380] sm:$0xff]  ;;  %v1073_v12 = vpack.c.bf16 %v471_v10, %v470_v9  ;;  %v503_v13 = vld [vmem:[%s1795_s2 + $0x388] sm:$0xff] }
  0x93   :  { %v1105_v14 = vpack.c.bf16 %v503_v13, %v502_v11  ;;  %v494_v9 = vld [vmem:[%s1795_s2 + $0x340] sm:$0xff]  ;;  %v495_v10 = vld [vmem:[%s1795_s2 + $0x348] sm:$0xff]  ;;  %v480_v11 = vld [vmem:[%s1795_s2 + $0x2d0] sm:$0xff] }
  0x94   :  { %v512_v13 = vld [vmem:[%s1795_s2 + $0x3d0] sm:$0xff] }
  0x95   :  { %317 = vmatpush1.bf16.msra.mxu0 %v1171_v21  ;;  %358 = vmatpush1.bf16.msra.mxu1 %v1172_v22  ;;  %v428_v21 = vld [vmem:[%s1795_s2 + $0x130] sm:$0xff]  ;;  %v429_v22 = vld [vmem:[%s1795_s2 + $0x138] sm:$0xff] }
  0x96   :  { %318 = vmatprep.subr.bf16.mxu0 %v1173_v23  ;;  %359 = vmatprep.subr.bf16.mxu1 %v1175_v24  ;;  %v414_v23 = vld [vmem:[%s1795_s2 + $0xc0] sm:$0xff]  ;;  %v415_v24 = vld [vmem:[%s1795_s2 + $0xc8] sm:$0xff] }
  0x99   :  { %319 = vmatpush1.bf16.msra.mxu0 %v1177_v25  ;;  %360 = vmatpush1.bf16.msra.mxu1 %v1178_v26  ;;  %v446_v25 = vld [vmem:[%s1795_s2 + $0x1c0] sm:$0xff]  ;;  %v447_v26 = vld [vmem:[%s1795_s2 + $0x1c8] sm:$0xff] }
  0x9a   :  { %320 = vmatprep.subr.bf16.mxu0 %v1179_v27  ;;  %361 = vmatprep.subr.bf16.mxu1 %v1181_v28  ;;  %v1023_v27 = vpack.c.bf16 %v397_v18, %v396_v17  ;;  %v1055_v28 = vpack.c.bf16 %v429_v22, %v428_v21  ;;  %v486_v17 = vld [vmem:[%s1795_s2 + $0x300] sm:$0xff]  ;;  %v487_v18 = vld [vmem:[%s1795_s2 + $0x308] sm:$0xff]  ;;  %v504_v21 = vld [vmem:[%s1795_s2 + $0x390] sm:$0xff] }
  0x9b   :  { %v505_v22 = vld [vmem:[%s1795_s2 + $0x398] sm:$0xff] }
  0x9d   :  { %321 = vmatpush1.bf16.msra.mxu0 %v1183_v29  ;;  %362 = vmatpush1.bf16.msra.mxu1 %v1184_v30  ;;  %v398_v29 = vld [vmem:[%s1795_s2 + $0x40] sm:$0xff]  ;;  %v399_v30 = vld [vmem:[%s1795_s2 + $0x48] sm:$0xff] }
  0x9e   :  { %322 = vmatprep.subr.bf16.mxu0 %v1185_v31  ;;  %363 = vmatprep.subr.bf16.mxu1 %v1187_v32  ;;  %v1025_v31 = vpack.c.bf16 %v415_v24, %v414_v23  ;;  %v1057_v32 = vpack.c.bf16 %v447_v26, %v446_v25  ;;  %v1027_v39 = vpack.c.bf16 %v399_v30, %v398_v29 }
  0x9f   :  { %v1107_v26 = vpack.c.bf16 %v487_v18, %v486_v17  ;;  %v464_v17 = vld [vmem:[%s1795_s2 + $0x250] sm:$0xff]  ;;  %v465_v18 = vld [vmem:[%s1795_s2 + $0x258] sm:$0xff] }
  0xa1   :  { %323 = vmatpush1.bf16.msra.mxu0 %v1365_v33  ;;  %364 = vmatpush1.bf16.msra.mxu1 %v1190_v34  ;;  %v430_v33 = vld [vmem:[%s1795_s2 + $0x140] sm:$0xff]  ;;  %v431_v34 = vld [vmem:[%s1795_s2 + $0x148] sm:$0xff] }
  0xa2   :  { %1010 = vmatprep.subr.bf16.mxu0 %v1009_v46  ;;  %1042 = vmatprep.subr.bf16.mxu1 %v1041_v47  ;;  %v1059_v40 = vpack.c.bf16 %v431_v34, %v430_v33  ;;  %v433_v46 = vld [vmem:[%s1795_s2 + $0x158] sm:$0xff]  ;;  %v418_v47 = vld [vmem:[%s1795_s2 + $0xe0] sm:$0xff]  ;;  %v488_v33 = vld [vmem:[%s1795_s2 + $0x310] sm:$0xff] }
  0xa3   :  { %v1063_v52 = vpack.c.bf16 %v433_v46, %v432_v45  ;;  %v489_v34 = vld [vmem:[%s1795_s2 + $0x318] sm:$0xff]  ;;  %v458_v45 = vld [vmem:[%s1795_s2 + $0x220] sm:$0xff]  ;;  %v459_v46 = vld [vmem:[%s1795_s2 + $0x228] sm:$0xff] }
  0xa4   :  { %866 = vmatmul.mubr.msk.bf16.vlgmr.msra.gmra.mrb[4].mxu0 %vm1426_vm3, %v1197_v38  ;;  %868 = vmatmul.mubr.msk.bf16.vlgmr.msra.gmra.mrb[4].mxu1 %vm1426_vm3, %v1197_v38  ;;  %v449_v38 = vld [vmem:[%s1795_s2 + $0x1d8] sm:$0xff] }
  0xa5   :  { %1012 = vmatpush3.bf16.msra.mxu0 %v1011_v55  ;;  %1044 = vmatpush3.bf16.msra.mxu1 %v1043_v56  ;;  %v1061_v44 = vpack.c.bf16 %v449_v38, %v448_v37  ;;  %v1033_v55 = vpack.c.bf16 %v419_v48, %v418_v47  ;;  %v1065_v56 = vpack.c.bf16 %v451_v50, %v450_v49  ;;  %v475_v38 = vld [vmem:[%s1795_s2 + $0x2a8] sm:$0xff]  ;;  %v490_v49 = vld [vmem:[%s1795_s2 + $0x320] sm:$0xff] }
  0xa6   :  { %1014 = vmatprep.subr.bf16.mxu0 %v1013_v59  ;;  %1046 = vmatprep.subr.bf16.mxu1 %v1045_v60  ;;  %v420_v59 = vld [vmem:[%s1795_s2 + $0xf0] sm:$0xff]  ;;  %v421_v60 = vld [vmem:[%s1795_s2 + $0xf8] sm:$0xff]  ;;  %v1081_v47 = vpack.c.bf16 %v475_v38, %v474_v35  ;;  %v491_v50 = vld [vmem:[%s1795_s2 + $0x328] sm:$0xff] }
  0xa7   :  { %v1037_v2 = vpack.c.bf16 %v421_v60, %v420_v59  ;;  %v1117_v60 = vpack.c.bf16 %v509_v54, %v508_v53  ;;  %v484_v35 = vld [vmem:[%s1795_s2 + $0x2f0] sm:$0xff]  ;;  %v517_v38 = vld [vmem:[%s1795_s2 + $0x3f8] sm:$0xff] }
  0xa9   :  { %1016 = vmatpush3.bf16.msra.mxu0 %v1015_v3  ;;  %1048 = vmatpush3.bf16.msra.mxu1 %v1047_v4  ;;  %v1069_v3 = vpack.c.bf16 %v453_v62, %v452_v61  ;;  %v405_v4 = vld [vmem:[%s1795_s2 + $0x78] sm:$0xff]  ;;  %v492_v61 = vld [vmem:[%s1795_s2 + $0x330] sm:$0xff] }
  0xaa   :  { %1018 = vmatprep.subr.bf16.mxu0 %v1017_v7  ;;  %1050 = vmatprep.subr.bf16.mxu1 %v1049_v8  ;;  %v1039_v7 = vpack.c.bf16 %v405_v4, %v404_v1  ;;  %v1071_v8 = vpack.c.bf16 %v437_v6, %v436_v5  ;;  %v493_v62 = vld [vmem:[%s1795_s2 + $0x338] sm:$0xff]  ;;  %v510_v1 = vld [vmem:[%s1795_s2 + $0x3c0] sm:$0xff]  ;;  %v463_v6 = vld [vmem:[%s1795_s2 + $0x248] sm:$0xff] }
  0xab   :  { %v1119_v4 = vpack.c.bf16 %v493_v62, %v492_v61  ;;  %v462_v5 = vld [vmem:[%s1795_s2 + $0x240] sm:$0xff] }
  0xad   :  { %1020 = vmatpush3.bf16.msra.mxu0 %v1019_v15  ;;  %1052 = vmatpush3.bf16.msra.mxu1 %v1051_v16  ;;  %v454_v15 = vld [vmem:[%s1795_s2 + $0x200] sm:$0xff]  ;;  %v455_v16 = vld [vmem:[%s1795_s2 + $0x208] sm:$0xff] }
  0xae   :  { %1022 = vmatprep.subr.bf16.mxu0 %v1021_v19  ;;  %1054 = vmatprep.subr.bf16.mxu1 %v1053_v20  ;;  %v472_v19 = vld [vmem:[%s1795_s2 + $0x290] sm:$0xff]  ;;  %v473_v20 = vld [vmem:[%s1795_s2 + $0x298] sm:$0xff]  ;;  %v1075_v25 = vpack.c.bf16 %v455_v16, %v454_v15  ;;  %v1091_v15 = vpack.c.bf16 %v463_v6, %v462_v5  ;;  %v1123_v16 = vpack.c.bf16 %v495_v10, %v494_v9 }
  0xb1   :  { %1024 = vmatpush3.bf16.msra.mxu0 %v1023_v27  ;;  %1056 = vmatpush3.bf16.msra.mxu1 %v1055_v28  ;;  %v456_v27 = vld [vmem:[%s1795_s2 + $0x210] sm:$0xff]  ;;  %v457_v28 = vld [vmem:[%s1795_s2 + $0x218] sm:$0xff] }
  0xb2   :  { %1026 = vmatprep.subr.bf16.mxu0 %v1025_v31  ;;  %1058 = vmatprep.subr.bf16.mxu1 %v1057_v32  ;;  %v1077_v31 = vpack.c.bf16 %v473_v20, %v472_v19  ;;  %v1109_v32 = vpack.c.bf16 %v505_v22, %v504_v21  ;;  %v496_v21 = vld [vmem:[%s1795_s2 + $0x350] sm:$0xff]  ;;  %v497_v22 = vld [vmem:[%s1795_s2 + $0x358] sm:$0xff] }
  0xb5   :  { %1028 = vmatpush3.bf16.msra.mxu0 %v1027_v39  ;;  %1060 = vmatpush3.bf16.msra.mxu1 %v1059_v40  ;;  %v506_v39 = vld [vmem:[%s1795_s2 + $0x3a0] sm:$0xff]  ;;  %v507_v40 = vld [vmem:[%s1795_s2 + $0x3a8] sm:$0xff] }
  0xb6   :  { %1030 = vmatprep.subr.bf16.mxu0 %v1029_v43  ;;  %1062 = vmatprep.subr.bf16.mxu1 %v1061_v44  ;;  %v1079_v43 = vpack.c.bf16 %v457_v28, %v456_v27  ;;  %v1111_v44 = vpack.c.bf16 %v489_v34, %v488_v33  ;;  %v1113_v48 = vpack.c.bf16 %v507_v40, %v506_v39  ;;  %v498_v33 = vld [vmem:[%s1795_s2 + $0x360] sm:$0xff]  ;;  %v499_v34 = vld [vmem:[%s1795_s2 + $0x368] sm:$0xff] }
  0xb7   :  { %v1095_v27 = vpack.c.bf16 %v465_v18, %v464_v17  ;;  %v1127_v28 = vpack.c.bf16 %v497_v22, %v496_v21  ;;  %v1131_v40 = vpack.c.bf16 %v499_v34, %v498_v33 }
  0xb9   :  { %1032 = vmatpush3.bf16.msra.mxu0 %v1031_v51  ;;  %1064 = vmatpush3.bf16.msra.mxu1 %v1063_v52  ;;  %v476_v51 = vld [vmem:[%s1795_s2 + $0x2b0] sm:$0xff]  ;;  %v477_v52 = vld [vmem:[%s1795_s2 + $0x2b8] sm:$0xff] }
  0xba   :  { %1034 = vmatprep.subr.bf16.mxu0 %v1033_v55  ;;  %1066 = vmatprep.subr.bf16.mxu1 %v1065_v56  ;;  %v1083_v55 = vpack.c.bf16 %v459_v46, %v458_v45  ;;  %v1115_v56 = vpack.c.bf16 %v491_v50, %v490_v49  ;;  %v1085_v59 = vpack.c.bf16 %v477_v52, %v476_v51  ;;  %v500_v45 = vld [vmem:[%s1795_s2 + $0x370] sm:$0xff]  ;;  %v501_v46 = vld [vmem:[%s1795_s2 + $0x378] sm:$0xff] }
  0xbd   :  { %1036 = vmatpush3.bf16.msra.mxu0 %v1035_v63  ;;  %1068 = vmatpush3.bf16.msra.mxu1 %v1067_v0  ;;  %v478_v63 = vld [vmem:[%s1795_s2 + $0x2c0] sm:$0xff]  ;;  %v479_v0 = vld [vmem:[%s1795_s2 + $0x2c8] sm:$0xff] }
  0xbe   :  { %1038 = vmatprep.subr.bf16.mxu0 %v1037_v2  ;;  %1070 = vmatprep.subr.bf16.mxu1 %v1069_v3  ;;  %v511_v2 = vld [vmem:[%s1795_s2 + $0x3c8] sm:$0xff]  ;;  %v1087_v3 = vpack.c.bf16 %v461_v58, %v460_v57 }
  0xc1   :  { %1040 = vmatpush3.bf16.msra.mxu0 %v1039_v7  ;;  %1072 = vmatpush3.bf16.msra.mxu1 %v1071_v8  ;;  %v1089_v7 = vpack.c.bf16 %v479_v0, %v478_v63  ;;  %v1121_v8 = vpack.c.bf16 %v511_v2, %v510_v1 }
  0xc2   :  { %1074 = vmatprep.subr.bf16.mxu0 %v1073_v12  ;;  %1106 = vmatprep.subr.bf16.mxu1 %v1105_v14  ;;  %v481_v12 = vld [vmem:[%s1795_s2 + $0x2d8] sm:$0xff] }
  0xc3   :  { %v513_v14 = vld [vmem:[%s1795_s2 + $0x3d8] sm:$0xff]  ;;  %v1093_v19 = vpack.c.bf16 %v481_v12, %v480_v11 }
  0xc4   :  { %v1125_v20 = vpack.c.bf16 %v513_v14, %v512_v13 }
 0x157   :  { %v260_v23 = vpop.f32.mrb[0].mxu0  ;;  %v301_v24 = vpop.f32.mrb[0].mxu1 }
 0x158   :  { %v262_v29 = vpop.f32.mrb[1].mxu0  ;;  %v303_v30 = vpop.f32.mrb[1].mxu1 }
 0x159   :  { %v264_v36 = vpop.f32.mrb[2].mxu0  ;;  %v305_v37 = vpop.f32.mrb[2].mxu1  ;;  %584 = vmatprep.mubr.f32.mxu0 %v262_v29  ;;  %654 = vmatprep.mubr.f32.mxu1 %v303_v30  ;;  %v466_v29 = vld [vmem:[%s1795_s2 + $0x260] sm:$0xff]  ;;  %v467_v30 = vld [vmem:[%s1795_s2 + $0x268] sm:$0xff] }
 0x15a   :  { %v265_v41 = vpop.f32.mrb[3].mxu0  ;;  %v306_v42 = vpop.f32.mrb[3].mxu1  ;;  %585 = vmatmul.mubr.f32.vlgmr.msra.gmra.mrb[8].mxu0 %v260_v23  ;;  %655 = vmatmul.mubr.f32.vlgmr.msra.gmra.mrb[8].mxu1 %v301_v24  ;;  %v482_v23 = vld [vmem:[%s1795_s2 + $0x2e0] sm:$0xff]  ;;  %v483_v24 = vld [vmem:[%s1795_s2 + $0x2e8] sm:$0xff]  ;;  %v485_v36 = vld [vmem:[%s1795_s2 + $0x2f8] sm:$0xff]  ;;  %v1099_v39 = vpack.c.bf16 %v467_v30, %v466_v29 }
 0x15b   :  { %1076 = vmatpush3.bf16.msra.mxu0 %v1075_v25  ;;  %1108 = vmatpush3.bf16.msra.mxu1 %v1107_v26  ;;  %v514_v25 = vld [vmem:[%s1795_s2 + $0x3e0] sm:$0xff]  ;;  %v515_v26 = vld [vmem:[%s1795_s2 + $0x3e8] sm:$0xff]  ;;  %v516_v37 = vld [vmem:[%s1795_s2 + $0x3f0] sm:$0xff]  ;;  %v1101_v42 = vpack.c.bf16 %v485_v36, %v484_v35 }
 0x15c   :  { %1078 = vmatprep.subr.bf16.mxu0 %v1077_v31  ;;  %1110 = vmatprep.subr.bf16.mxu1 %v1109_v32  ;;  %v1097_v31 = vpack.c.bf16 %v483_v24, %v482_v23  ;;  %v1129_v32 = vpack.c.bf16 %v515_v26, %v514_v25  ;;  %v468_v41 = vld [vmem:[%s1795_s2 + $0x270] sm:$0xff] }
 0x15f   :  { %1080 = vmatpush3.bf16.msra.mxu0 %v1079_v43  ;;  %1112 = vmatpush3.bf16.msra.mxu1 %v1111_v44  ;;  %v1133_v43 = vpack.c.bf16 %v517_v38, %v516_v37  ;;  %v469_v44 = vld [vmem:[%s1795_s2 + $0x278] sm:$0xff] }
 0x160   :  { %1082 = vmatprep.subr.bf16.mxu0 %v1081_v47  ;;  %1114 = vmatprep.subr.bf16.mxu1 %v1113_v48  ;;  %v1103_v47 = vpack.c.bf16 %v469_v44, %v468_v41  ;;  %v1135_v48 = vpack.c.bf16 %v501_v46, %v500_v45 }
 0x163   :  { %1084 = vmatpush3.bf16.msra.mxu0 %v1083_v55  ;;  %1116 = vmatpush3.bf16.msra.mxu1 %v1115_v56 }
 0x164   :  { %1086 = vmatprep.subr.bf16.mxu0 %v1085_v59  ;;  %1118 = vmatprep.subr.bf16.mxu1 %v1117_v60  ;;  %v519_v59 = vstv %s1796_s3  ;;  %s1198_s3 = smov 1  }
 0x167   :  { %1088 = vmatpush3.bf16.msra.mxu0 %v1087_v3  ;;  %1120 = vmatpush3.bf16.msra.mxu1 %v1119_v4 }
 0x168   :  { %1090 = vmatprep.subr.bf16.mxu0 %v1089_v7  ;;  %1122 = vmatprep.subr.bf16.mxu1 %v1121_v8 }
 0x16b   :  { %1092 = vmatpush3.bf16.msra.mxu0 %v1091_v15  ;;  %1124 = vmatpush3.bf16.msra.mxu1 %v1123_v16 }
 0x16c   :  { %1094 = vmatprep.subr.bf16.mxu0 %v1093_v19  ;;  %1126 = vmatprep.subr.bf16.mxu1 %v1125_v20 }
 0x16f   :  { %1096 = vmatpush3.bf16.msra.mxu0 %v1095_v27  ;;  %1128 = vmatpush3.bf16.msra.mxu1 %v1127_v28 }
 0x170   :  { %1098 = vmatprep.subr.bf16.mxu0 %v1097_v31  ;;  %1130 = vmatprep.subr.bf16.mxu1 %v1129_v32 }
 0x173   :  { %1100 = vmatpush3.bf16.msra.mxu0 %v1099_v39  ;;  %1132 = vmatpush3.bf16.msra.mxu1 %v1131_v40 }
 0x174   :  { %1102 = vmatprep.subr.bf16.mxu0 %v1101_v42  ;;  %1134 = vmatprep.subr.bf16.mxu1 %v1133_v43 }
 0x177   :  { %v342_v49 = vpop.f32.mrb[4].mxu0  ;;  %v383_v50 = vpop.f32.mrb[4].mxu1  ;;  %1104 = vmatpush3.bf16.msra.mxu0 %v1103_v47  ;;  %1136 = vmatpush3.bf16.msra.mxu1 %v1135_v48 }
 0x178   :  { %v344_v51 = vpop.f32.mrb[5].mxu0  ;;  %v385_v52 = vpop.f32.mrb[5].mxu1 }
 0x179   :  { %v346_v53 = vpop.f32.mrb[6].mxu0  ;;  %v387_v54 = vpop.f32.mrb[6].mxu1  ;;  %724 = vmatprep.mubr.f32.mxu0 %v344_v51  ;;  %794 = vmatprep.mubr.f32.mxu1 %v385_v52 }
 0x17a   :  { %v347_v55 = vpop.f32.mrb[7].mxu0  ;;  %v388_v56 = vpop.f32.mrb[7].mxu1  ;;  %725 = vmatmul.mubr.f32.vlgmr.msra.gmra.mrb[10].mxu0 %v342_v49  ;;  %795 = vmatmul.mubr.f32.vlgmr.msra.gmra.mrb[10].mxu1 %v383_v50 }
 0x22d   :  { %v901_v57 = vpop.f32.mrb[8].mxu0  ;;  %v936_v58 = vpop.f32.mrb[8].mxu1 }
 0x22e   :  { %v902_v60 = vpop.f32.mrb[9].mxu0  ;;  %v937_v61 = vpop.f32.mrb[9].mxu1 }
 0x22f   :  { %v903_v62 = vadd.f32 %v902_v60, %v901_v57  ;;  %v938_v63 = vadd.f32 %v937_v61, %v936_v58 }
 0x231   :  { %v587_v0 = vadd.f32 %v903_v62, %v519_v59 }
 0x233   :  { %v657_v1 = vadd.f32 %v938_v63, %v587_v0 }
 0x24d   :  { %v971_v2 = vpop.f32.mrb[10].mxu0  ;;  %v1006_v3 = vpop.f32.mrb[10].mxu1 }
 0x24e   :  { %v972_v4 = vpop.f32.mrb[11].mxu0  ;;  %v1007_v5 = vpop.f32.mrb[11].mxu1 }
 0x24f   :  { %v973_v6 = vadd.f32 %v972_v4, %v971_v2  ;;  %v1008_v7 = vadd.f32 %v1007_v5, %v1006_v3 }
 0x251   :  { %v727_v8 = vadd.f32 %v973_v6, %v657_v1 }
 0x253   :  { %v797_v9 = vadd.f32 %v1008_v7, %v727_v8 }
 0x255   :  { %v801_v10 = vand.u32 2147483647, %v797_v9  ;;  %v800_v21 = vmax.f32 %v797_v9, 0.0 }
 0x257   :  { %v802_v11 = vsub.f32 0.0, %v801_v10 }
 0x259   :  { %v803_v12 = vmul.f32 1.442695, %v802_v11 }
 0x25b   :  { %1191 = vpow2.f32 %v803_v12 }
 0x265   :  { %v1192_v13 = vpop.eup %1191 }
 0x266   :  { %v805_v14 = vadd.f32 1.0, %v1192_v13  ;;  %v808_v15 = vmul.f32 -0.5, %v1192_v13  ;;  %v811_v17 = vand.u32 2147483647, %v1192_v13 }
 0x268   :  { %1193 = vlog2.f32 %v805_v14  ;;  %v809_v16 = vadd.f32 1.0, %v808_v15  ;;  %vm812_vm4 = vcmp.lt.f32.partialorder %v811_v17, 0.0004427343 }
 0x26a   :  { %v810_v20 = vmul.f32 %v1192_v13, %v809_v16 }
 0x272   :  { %v1194_v18 = vpop.eup %1193 }
 0x273   :  { %v807_v19 = vmul.f32 0.6931472, %v1194_v18 }
 0x275   :  { %v813_v22 = vsel %vm812_vm4, %v810_v20, %v807_v19 }
 0x276   :  { %v814_v23 = vadd.f32 %v813_v22, %v800_v21 }
 0x278   :  { %v818_v24 = vsub.f32 %v797_v9, %v814_v23  ;;  %v815_v25 = vsub.f32 0.0, %v814_v23 }
 0x27a   :  { %820 = vrot.lane.b32.xlu1 %v818_v24, %s1198_s3  ;;  %817 = vst.msk [vmem:[%s1797_s4] sm:$0xff] %vm816_vm5, %v815_v25 }
 0x2ec   :  { %v821_v26 = vpop.permute.xlu1 %820 }
 0x2ed   :  { %824 = vst.msk [vmem:[%s1797_s4] sm:$0xff] %vm823_vm6, %v821_v26 }

</bundles_post_ra>
